<compile_context>
chip_gen: v7x
topology: tpu7x:2x2x1
jax: 0.10.0
libtpu: 0.0.40
codegen_flags: <defaults>
</compile_context>

<pallas_src>
import jax
import jax.numpy as jnp
from jax.experimental import pallas as pl
from jax.experimental.pallas import tpu as pltpu


def _round_up(v, m):
    return ((v + m - 1) // m) * m


def _kernel(x_ref, row_ref, col_ref, edge_ref, w_x_ref, w_e_ref, b_ref,
            out_ref, x_proj_ref, sums_ref, counts_ref):
    n_nodes = x_ref.shape[0]
    te = edge_ref.shape[0]
    i = pl.program_id(0)

    @pl.when(i == 0)
    def _init():
        # Project node features once: (N, F_in) @ (F_in, F_out_pad) -> (N, F_out_pad).
        proj = jnp.dot(x_ref[...], w_x_ref[...],
                       preferred_element_type=jnp.float32)
        x_proj_ref[...] = proj.astype(x_proj_ref.dtype)
        sums_ref[...] = jnp.zeros_like(sums_ref)
        counts_ref[...] = jnp.zeros_like(counts_ref)

    row = row_ref[...]            # (TE, 1) int32 — source node per edge
    col = col_ref[...]            # (1, TE) int32 — destination node per edge

    # Per-tile one-hot matrices (exact in bf16). Out-of-range / padded indices
    # produce all-zero rows/columns, i.e. the padded edges contribute nothing.
    gather_oh = (jax.lax.broadcasted_iota(jnp.int32, (te, n_nodes), 1) == row
                 ).astype(jnp.bfloat16)                     # (TE, N): [t, n] = (n == row[t])
    scatter_oh = (jax.lax.broadcasted_iota(jnp.int32, (n_nodes, te), 0) == col
                  ).astype(jnp.bfloat16)                    # (N, TE): [n, t] = (n == col[t])

    # gather(x_proj)[row] + edge_attr @ (edge_importance * W_e)  -> per-edge update.
    atom_proj = jnp.dot(gather_oh, x_proj_ref[...],
                        preferred_element_type=jnp.float32)  # (TE, F_out_pad)
    edge_proj = jnp.dot(edge_ref[...], w_e_ref[...],
                        preferred_element_type=jnp.float32)  # (TE, F_out_pad)
    updated = (atom_proj + edge_proj).astype(jnp.bfloat16)

    # Segment-sum into persistent VMEM accumulators; counts ride on the MXU too.
    sums_ref[...] += jnp.dot(scatter_oh, updated,
                             preferred_element_type=jnp.float32)
    counts_ref[...] += jnp.dot(scatter_oh, jnp.ones((te, 1), jnp.bfloat16),
                               preferred_element_type=jnp.float32)

    @pl.when(i == pl.num_programs(0) - 1)
    def _finalize():
        cnt = counts_ref[...]                               # (N, 1)
        inv = pl.reciprocal(jnp.maximum(cnt, 1.0), approx=True)
        mean = sums_ref[...] * inv                          # 0 for isolated nodes
        # Bias once per non-empty node (== per-edge bias averaged back).
        out_ref[...] = mean + jnp.where(cnt > 0.0, b_ref[...], 0.0)


def atom_edge_interaction(x, edge_index, edge_attr, weight, bias,
                          edge_importance=1.0, tile_edges=128):
    """x: (N, F_in) f32, edge_index: (2, E) int, edge_attr: (E, F_e) f32,
       weight: (F_out, F_in + F_e) f32 (PyTorch Linear layout), bias: (F_out,) f32."""
    N, f_in = x.shape
    E, f_e = edge_attr.shape
    f_out = weight.shape[0]

    te = tile_edges                        # lane dim of the col tile -> multiple of 128
    e_pad = _round_up(max(E, 1), te)
    f_out_pad = _round_up(max(f_out, 1), 128)   # lane-dense output / matmul columns

    row = edge_index[0].astype(jnp.int32)
    col = edge_index[1].astype(jnp.int32)
    row = jnp.pad(row, (0, e_pad - E), constant_values=0).reshape(e_pad, 1)
    # Padded edges get destination N (out of range) so the scatter one-hot drops them.
    col = jnp.pad(col, (0, e_pad - E), constant_values=N).reshape(1, e_pad)
    edge_attr_p = jnp.pad(edge_attr.astype(jnp.float32),
                          ((0, e_pad - E), (0, 0))).astype(jnp.bfloat16)

    # Split / transpose the Linear weight; pad the output dim; fold edge_importance
    # into W_e so the kernel never sees it (no retrace per importance value).
    w_t = weight.astype(jnp.float32).T                     # (F_in + F_e, F_out)
    w_x = jnp.pad(w_t[:f_in, :], ((0, 0), (0, f_out_pad - f_out)))          # f32
    w_e = (jnp.pad(w_t[f_in:, :], ((0, 0), (0, f_out_pad - f_out)))
           * jnp.float32(edge_importance)).astype(jnp.bfloat16)
    b = jnp.pad(bias.astype(jnp.float32).reshape(1, f_out),
                ((0, 0), (0, f_out_pad - f_out)))

    grid = (e_pad // te,)
    out = pl.pallas_call(
        _kernel,
        out_shape=jax.ShapeDtypeStruct((N, f_out_pad), jnp.float32),
        grid=grid,
        in_specs=[
            pl.BlockSpec((N, f_in), lambda i: (0, 0)),        # x (resident)
            pl.BlockSpec((te, 1), lambda i: (i, 0)),          # row tile
            pl.BlockSpec((1, te), lambda i: (0, i)),          # col tile
            pl.BlockSpec((te, f_e), lambda i: (i, 0)),        # edge_attr tile
            pl.BlockSpec((f_in, f_out_pad), lambda i: (0, 0)),  # W_x (resident)
            pl.BlockSpec((f_e, f_out_pad), lambda i: (0, 0)),   # W_e (resident)
            pl.BlockSpec((1, f_out_pad), lambda i: (0, 0)),     # bias (resident)
        ],
        out_specs=pl.BlockSpec((N, f_out_pad), lambda i: (0, 0)),
        scratch_shapes=[
            pltpu.VMEM((N, f_out_pad), jnp.bfloat16),   # x_proj = x @ W_x
            pltpu.VMEM((N, f_out_pad), jnp.float32),    # segment sums
            pltpu.VMEM((N, 1), jnp.float32),            # segment counts
        ],
        compiler_params=pltpu.CompilerParams(
            dimension_semantics=("arbitrary",),          # edge axis is a reduction
            vmem_limit_bytes=32 * 1024 * 1024,           # explicit (v5e default is 16 MiB)
        ),
    )(x.astype(jnp.float32), row, col, edge_attr_p, w_x, w_e, b)

    return out[:, :f_out]


def reference(x, edge_index, edge_attr, weight, bias, edge_importance=1.0):
    """Plain-JAX f32 reference mirroring the PyTorch forward (incl. scatter_mean)."""
    row, col = edge_index[0], edge_index[1]
    atom = x[row]
    edge_features = edge_attr * edge_importance
    combined = jnp.concatenate([atom, edge_features], axis=-1)
    updated = combined @ weight.T + bias
    N = x.shape[0]
    sums = jnp.zeros((N, updated.shape[-1]), jnp.float32).at[col].add(updated)
    counts = jnp.zeros((N, 1), jnp.float32).at[col].add(1.0)
    return sums / jnp.maximum(counts, 1.0)


if __name__ == "__main__":
    key = jax.random.PRNGKey(0)
    k_x, k_e, k_ei, k_w, k_b = jax.random.split(key, 5)

    # Small synthetic graph consistent with the module's forward.
    # TODO(synk): the original script loads QM_137k.pt via torch.load; synthetic
    # inputs of matching structure are used instead.
    N = 24            # number of atoms/nodes
    E = 200           # number of edges (-> 2 edge tiles of 128 after padding)
    in_features = 8
    edge_features = 4
    out_features = 1  # matches the original script

    x = jax.random.normal(k_x, (N, in_features), dtype=jnp.float32)
    edge_attr = jax.random.normal(k_e, (E, edge_features), dtype=jnp.float32)
    edge_index = jax.random.randint(k_ei, (2, E), 0, N, dtype=jnp.int32)

    # Deterministic Linear(in_features + edge_features, out_features) params.
    fan_in = in_features + edge_features
    bound = 1.0 / (fan_in ** 0.5)
    weight = jax.random.uniform(k_w, (out_features, fan_in),
                                minval=-bound, maxval=bound, dtype=jnp.float32)
    bias = jax.random.uniform(k_b, (out_features,),
                              minval=-bound, maxval=bound, dtype=jnp.float32)

    out = atom_edge_interaction(x, edge_index, edge_attr, weight, bias,
                                edge_importance=1.0)
    out = jax.block_until_ready(out)

    ref = reference(x, edge_index, edge_attr, weight, bias, edge_importance=1.0)
    assert out.shape == (N, out_features)
    # bf16 MXU inputs (f32 accumulation) vs. a pure-f32 reference -> relaxed tolerance.
    assert jnp.allclose(out, ref, atol=3e-2, rtol=3e-2), "mismatch vs reference"

    print("KERNEL_OK")
</pallas_src>

<mosaic_0001>
module attributes {stable_mosaic.version = 11 : i64} {
  func.func @_kernel(%arg0: i32, %arg1: memref<24x8xf32, #tpu.memory_space<vmem>>, %arg2: memref<128x1xi32, #tpu.memory_space<vmem>>, %arg3: memref<1x128xi32, #tpu.memory_space<vmem>>, %arg4: memref<128x4xbf16, #tpu.memory_space<vmem>>, %arg5: memref<8x128xf32, #tpu.memory_space<vmem>>, %arg6: memref<4x128xbf16, #tpu.memory_space<vmem>>, %arg7: memref<1x128xf32, #tpu.memory_space<vmem>>, %arg8: memref<24x128xf32, #tpu.memory_space<vmem>>, %arg9: memref<24x128xbf16, #tpu.memory_space<vmem>>, %arg10: memref<24x128xf32, #tpu.memory_space<vmem>>, %arg11: memref<24x1xf32, #tpu.memory_space<vmem>>) attributes {dimension_semantics = [#tpu.dimension_semantics<arbitrary>], iteration_bounds = array<i64: 2>, scalar_prefetch = 0 : i64, scratch_operands = 3 : i64, tpu.core_type = #tpu.core_type<tc>, window_params = [{pipeline_mode = #tpu.pipeline_mode<synchronous>, transform_indices = @transform_0, window_bounds = array<i64: 24, 8>}, {transform_indices = @transform_1, window_bounds = array<i64: 128, 1>}, {transform_indices = @transform_2, window_bounds = array<i64: 1, 128>}, {transform_indices = @transform_3, window_bounds = array<i64: 128, 4>}, {pipeline_mode = #tpu.pipeline_mode<synchronous>, transform_indices = @transform_4, window_bounds = array<i64: 8, 128>}, {pipeline_mode = #tpu.pipeline_mode<synchronous>, transform_indices = @transform_5, window_bounds = array<i64: 4, 128>}, {pipeline_mode = #tpu.pipeline_mode<synchronous>, transform_indices = @transform_6, window_bounds = array<i64: 1, 128>}, {pipeline_mode = #tpu.pipeline_mode<synchronous>, transform_indices = @transform_7, window_bounds = array<i64: 24, 128>}]} {
    %c0_i32 = arith.constant 0 : i32
    %0 = arith.cmpi eq, %arg0, %c0_i32 : i32
    %1 = arith.extui %0 : i1 to i32
    %c0_i32_0 = arith.constant 0 : i32
    %2 = arith.cmpi ne, %1, %c0_i32_0 : i32
    scf.if %2 {
      %c0_23 = arith.constant 0 : index
      %c0_24 = arith.constant 0 : index
      %36 = vector.load %arg1[%c0_23, %c0_24] : memref<24x8xf32, #tpu.memory_space<vmem>>, vector<24x8xf32>
      %c0_25 = arith.constant 0 : index
      %c0_26 = arith.constant 0 : index
      %37 = vector.load %arg5[%c0_25, %c0_26] : memref<8x128xf32, #tpu.memory_space<vmem>>, vector<8x128xf32>
      %cst_27 = arith.constant dense<0.000000e+00> : vector<24x128xf32>
      %38 = tpu.matmul %36, %37, %cst_27 {dimension_numbers = #tpu.dot_dimension_numbers<[1], [0], [0], [1], [0, 0, 1, 1], [], []>} : vector<24x8xf32>, vector<8x128xf32>, vector<24x128xf32> -> vector<24x128xf32>
      %39 = arith.truncf %38 : vector<24x128xf32> to vector<24x128xbf16>
      %c0_28 = arith.constant 0 : index
      %c0_29 = arith.constant 0 : index
      %40 = vector.load %arg9[%c0_28, %c0_29] : memref<24x128xbf16, #tpu.memory_space<vmem>>, vector<24x128xbf16>
      tpu.vector_store %arg9[%c0_28, %c0_29], %39 {strides = array<i32>} : memref<24x128xbf16, #tpu.memory_space<vmem>>, vector<24x128xbf16>,
      %cst_30 = arith.constant 0.000000e+00 : f32
      %41 = vector.broadcast %cst_30 : f32 to vector<24x128xf32>
      %c0_31 = arith.constant 0 : index
      %c0_32 = arith.constant 0 : index
      %42 = vector.load %arg10[%c0_31, %c0_32] : memref<24x128xf32, #tpu.memory_space<vmem>>, vector<24x128xf32>
      tpu.vector_store %arg10[%c0_31, %c0_32], %41 {strides = array<i32>} : memref<24x128xf32, #tpu.memory_space<vmem>>, vector<24x128xf32>,
      %cst_33 = arith.constant 0.000000e+00 : f32
      %43 = vector.broadcast %cst_33 : f32 to vector<24x1xf32>
      %c0_34 = arith.constant 0 : index
      %c0_35 = arith.constant 0 : index
      %44 = vector.load %arg11[%c0_34, %c0_35] : memref<24x1xf32, #tpu.memory_space<vmem>>, vector<24x1xf32>
      tpu.vector_store %arg11[%c0_34, %c0_35], %43 {strides = array<i32>} : memref<24x1xf32, #tpu.memory_space<vmem>>, vector<24x1xf32>,
    } else {
    }
    %c0 = arith.constant 0 : index
    %c0_1 = arith.constant 0 : index
    %3 = vector.load %arg2[%c0, %c0_1] : memref<128x1xi32, #tpu.memory_space<vmem>>, vector<128x1xi32>
    %c0_2 = arith.constant 0 : index
    %c0_3 = arith.constant 0 : index
    %4 = vector.load %arg3[%c0_2, %c0_3] : memref<1x128xi32, #tpu.memory_space<vmem>>, vector<1x128xi32>
    %5 = tpu.iota {dimensions = array<i32: 1>} : vector<128x24xi32>
    %6 = vector.broadcast %3 : vector<128x1xi32> to vector<128x24xi32>
    %7 = arith.cmpi eq, %5, %6 : vector<128x24xi32>
    %8 = arith.extui %7 : vector<128x24xi1> to vector<128x24xi32>
    %9 = arith.sitofp %8 : vector<128x24xi32> to vector<128x24xf32>
    %10 = arith.truncf %9 : vector<128x24xf32> to vector<128x24xbf16>
    %11 = tpu.iota {dimensions = array<i32: 0>} : vector<24x128xi32>
    %12 = vector.broadcast %4 : vector<1x128xi32> to vector<24x128xi32>
    %13 = arith.cmpi eq, %11, %12 : vector<24x128xi32>
    %14 = arith.extui %13 : vector<24x128xi1> to vector<24x128xi32>
    %15 = arith.sitofp %14 : vector<24x128xi32> to vector<24x128xf32>
    %16 = arith.truncf %15 : vector<24x128xf32> to vector<24x128xbf16>
    %c0_4 = arith.constant 0 : index
    %c0_5 = arith.constant 0 : index
    %17 = vector.load %arg9[%c0_4, %c0_5] : memref<24x128xbf16, #tpu.memory_space<vmem>>, vector<24x128xbf16>
    %cst = arith.constant dense<0.000000e+00> : vector<128x128xf32>
    %18 = tpu.matmul %10, %17, %cst {dimension_numbers = #tpu.dot_dimension_numbers<[1], [0], [0], [1], [0, 0, 1, 1], [], []>} : vector<128x24xbf16>, vector<24x128xbf16>, vector<128x128xf32> -> vector<128x128xf32>
    %c0_6 = arith.constant 0 : index
    %c0_7 = arith.constant 0 : index
    %19 = vector.load %arg4[%c0_6, %c0_7] : memref<128x4xbf16, #tpu.memory_space<vmem>>, vector<128x4xbf16>
    %c0_8 = arith.constant 0 : index
    %c0_9 = arith.constant 0 : index
    %20 = vector.load %arg6[%c0_8, %c0_9] : memref<4x128xbf16, #tpu.memory_space<vmem>>, vector<4x128xbf16>
    %cst_10 = arith.constant dense<0.000000e+00> : vector<128x128xf32>
    %21 = tpu.matmul %19, %20, %cst_10 {dimension_numbers = #tpu.dot_dimension_numbers<[1], [0], [0], [1], [0, 0, 1, 1], [], []>} : vector<128x4xbf16>, vector<4x128xbf16>, vector<128x128xf32> -> vector<128x128xf32>
    %22 = arith.addf %18, %21 : vector<128x128xf32>
    %23 = arith.truncf %22 : vector<128x128xf32> to vector<128x128xbf16>
    %c0_11 = arith.constant 0 : index
    %c0_12 = arith.constant 0 : index
    %24 = vector.load %arg10[%c0_11, %c0_12] : memref<24x128xf32, #tpu.memory_space<vmem>>, vector<24x128xf32>
    %cst_13 = arith.constant dense<0.000000e+00> : vector<24x128xf32>
    %25 = tpu.matmul %16, %23, %cst_13 {dimension_numbers = #tpu.dot_dimension_numbers<[1], [0], [0], [1], [0, 0, 1, 1], [], []>} : vector<24x128xbf16>, vector<128x128xbf16>, vector<24x128xf32> -> vector<24x128xf32>
    %26 = arith.addf %24, %25 : vector<24x128xf32>
    %c0_14 = arith.constant 0 : index
    %c0_15 = arith.constant 0 : index
    %27 = vector.load %arg10[%c0_14, %c0_15] : memref<24x128xf32, #tpu.memory_space<vmem>>, vector<24x128xf32>
    tpu.vector_store %arg10[%c0_14, %c0_15], %26 {strides = array<i32>} : memref<24x128xf32, #tpu.memory_space<vmem>>, vector<24x128xf32>,
    %c0_16 = arith.constant 0 : index
    %c0_17 = arith.constant 0 : index
    %28 = vector.load %arg11[%c0_16, %c0_17] : memref<24x1xf32, #tpu.memory_space<vmem>>, vector<24x1xf32>
    %cst_18 = arith.constant 1.000000e+00 : bf16
    %29 = vector.broadcast %cst_18 : bf16 to vector<128x1xbf16>
    %cst_19 = arith.constant dense<0.000000e+00> : vector<24x1xf32>
    %30 = tpu.matmul %16, %29, %cst_19 {dimension_numbers = #tpu.dot_dimension_numbers<[1], [0], [0], [1], [0, 0, 1, 1], [], []>} : vector<24x128xbf16>, vector<128x1xbf16>, vector<24x1xf32> -> vector<24x1xf32>
    %31 = arith.addf %28, %30 : vector<24x1xf32>
    %c0_20 = arith.constant 0 : index
    %c0_21 = arith.constant 0 : index
    %32 = vector.load %arg11[%c0_20, %c0_21] : memref<24x1xf32, #tpu.memory_space<vmem>>, vector<24x1xf32>
    tpu.vector_store %arg11[%c0_20, %c0_21], %31 {strides = array<i32>} : memref<24x1xf32, #tpu.memory_space<vmem>>, vector<24x1xf32>,
    %c1_i32 = arith.constant 1 : i32
    %33 = arith.cmpi eq, %arg0, %c1_i32 : i32
    %34 = arith.extui %33 : i1 to i32
    %c0_i32_22 = arith.constant 0 : i32
    %35 = arith.cmpi ne, %34, %c0_i32_22 : i32
    scf.if %35 {
      %c0_23 = arith.constant 0 : index
      %c0_24 = arith.constant 0 : index
      %36 = vector.load %arg11[%c0_23, %c0_24] : memref<24x1xf32, #tpu.memory_space<vmem>>, vector<24x1xf32>
      %cst_25 = arith.constant 1.000000e+00 : f32
      %37 = vector.broadcast %cst_25 : f32 to vector<24x1xf32>
      %38 = arith.maximumf %36, %37 : vector<24x1xf32>
      %39 = tpu.reciprocal %38 {approx = true} : vector<24x1xf32> -> vector<24x1xf32>
      %c0_26 = arith.constant 0 : index
      %c0_27 = arith.constant 0 : index
      %40 = vector.load %arg10[%c0_26, %c0_27] : memref<24x128xf32, #tpu.memory_space<vmem>>, vector<24x128xf32>
      %41 = vector.broadcast %39 : vector<24x1xf32> to vector<24x128xf32>
      %42 = arith.mulf %40, %41 : vector<24x128xf32>
      %cst_28 = arith.constant 0.000000e+00 : f32
      %43 = vector.broadcast %cst_28 : f32 to vector<24x1xf32>
      %44 = arith.cmpf ogt, %36, %43 : vector<24x1xf32>
      %c0_29 = arith.constant 0 : index
      %c0_30 = arith.constant 0 : index
      %45 = vector.load %arg7[%c0_29, %c0_30] : memref<1x128xf32, #tpu.memory_space<vmem>>, vector<1x128xf32>
      %cst_31 = arith.constant 0.000000e+00 : f32
      %46 = vector.shape_cast %44 : vector<24x1xi1> to vector<24x1xi1>
      %47 = vector.broadcast %46 : vector<24x1xi1> to vector<24x128xi1>
      %48 = vector.shape_cast %45 : vector<1x128xf32> to vector<1x128xf32>
      %49 = vector.broadcast %48 : vector<1x128xf32> to vector<24x128xf32>
      %50 = vector.broadcast %cst_31 : f32 to vector<24x128xf32>
      %51 = arith.select %47, %49, %50 : vector<24x128xi1>, vector<24x128xf32>
      %52 = arith.addf %42, %51 : vector<24x128xf32>
      %c0_32 = arith.constant 0 : index
      %c0_33 = arith.constant 0 : index
      %53 = vector.load %arg8[%c0_32, %c0_33] : memref<24x128xf32, #tpu.memory_space<vmem>>, vector<24x128xf32>
      tpu.vector_store %arg8[%c0_32, %c0_33], %52 {strides = array<i32>} : memref<24x128xf32, #tpu.memory_space<vmem>>, vector<24x128xf32>,
    } else {
    }
    return
  }
  func.func @transform_0(%arg0: i32) -> (i32, i32) {
    %c0_i32 = arith.constant 0 : i32
    %c0_i32_0 = arith.constant 0 : i32
    %c0_i32_1 = arith.constant 0 : i32
    return %c0_i32, %c0_i32_0 : i32, i32
  }
  func.func @transform_1(%arg0: i32) -> (i32, i32) {
    %c0_i32 = arith.constant 0 : i32
    %c0_i32_0 = arith.constant 0 : i32
    return %arg0, %c0_i32 : i32, i32
  }
  func.func @transform_2(%arg0: i32) -> (i32, i32) {
    %c0_i32 = arith.constant 0 : i32
    %c0_i32_0 = arith.constant 0 : i32
    return %c0_i32, %arg0 : i32, i32
  }
  func.func @transform_3(%arg0: i32) -> (i32, i32) {
    %c0_i32 = arith.constant 0 : i32
    %c0_i32_0 = arith.constant 0 : i32
    return %arg0, %c0_i32 : i32, i32
  }
  func.func @transform_4(%arg0: i32) -> (i32, i32) {
    %c0_i32 = arith.constant 0 : i32
    %c0_i32_0 = arith.constant 0 : i32
    %c0_i32_1 = arith.constant 0 : i32
    return %c0_i32, %c0_i32_0 : i32, i32
  }
  func.func @transform_5(%arg0: i32) -> (i32, i32) {
    %c0_i32 = arith.constant 0 : i32
    %c0_i32_0 = arith.constant 0 : i32
    %c0_i32_1 = arith.constant 0 : i32
    return %c0_i32, %c0_i32_0 : i32, i32
  }
  func.func @transform_6(%arg0: i32) -> (i32, i32) {
    %c0_i32 = arith.constant 0 : i32
    %c0_i32_0 = arith.constant 0 : i32
    %c0_i32_1 = arith.constant 0 : i32
    return %c0_i32, %c0_i32_0 : i32, i32
  }
  func.func @transform_7(%arg0: i32) -> (i32, i32) {
    %c0_i32 = arith.constant 0 : i32
    %c0_i32_0 = arith.constant 0 : i32
    %c0_i32_1 = arith.constant 0 : i32
    return %c0_i32, %c0_i32_0 : i32, i32
  }
}

</mosaic_0001>

<bundles_post_ra>
// kernel: tpu_custom_call.1
= control target key start
LH: loop header
LB: loop body
LE: loop exit
PB: predicated region body
PF: predicated region fallthrough
CT: control target
= control target key end

     0   :  { %12 = vsyncpa [#allocation6], 0  ;;  %s1516_s24 = smov 0   ;;  %s1674_s0 = inlined_call_operand.vmem [shape: f32[24,8], index: 0, kind: input, shape index: {}]   ;;  %s1675_s1 = inlined_call_operand.vmem [shape: s32[256,1], index: 1, kind: input, shape index: {}]   ;;  %s1676_s2 = inlined_call_operand.vmem [shape: s32[1,256], index: 2, kind: input, shape index: {}]   ;;  %s1677_s3 = inlined_call_operand.vmem [shape: bf16[256,4], index: 3, kind: input, shape index: {}]   ;;  %s1678_s4 = inlined_call_operand.vmem [shape: f32[8,128], index: 4, kind: input, shape index: {}]   ;;  %s1679_s5 = inlined_call_operand.vmem [shape: bf16[4,128], index: 5, kind: input, shape index: {}]   ;;  %s1680_s6 = inlined_call_operand.vmem [shape: f32[1,128], index: 6, kind: input, shape index: {}]   ;;  %s1681_s7 = inlined_call_operand.hbm [shape: f32[24,128], index: 7, kind: output, shape index: {}]  }
   0x1 LB: > { %s1522_s25 = sadd.s32 4294967295, %s1464_s24   ;;  %p1152_p0 = scmp.ge.s32.totalorder %s1464_s24, 1  ;;  %s1464_s24 = sphi %s1516_s24, %s18_s24  }
   0x2   : > { %p253_p1 = scmp.lt.s32.totalorder %s1464_s24, 3 }
   0x4   : > { %p254_p2 = pnand %p1152_p0, %p253_p1 }
   0x5   : > { %s1153_s26 = sshll.u32 (!%p254_p2), %s1522_s25, 4  ;;  %p294_p3 = scmp.lt.s32.totalorder (!%p254_p2), %s1522_s25, 1 }
   0x6   : > { %257 = sbr.rel (%p254_p2) target bundleno = 1061 (0x425), region = 48  ;;  %p289_p4 = scmp.lt.s32.totalorder (!%p254_p2), %s1153_s26, 31 }
   0x7   : > { %p1157_p5 = scmp.ne.s32.totalorder (!%p254_p2), %s1522_s25, 0 }
   0xd   : > { %s1529_s27 = scalar_select %p294_p3, %s1522_s25, 1 }
   0xe   : > { %s1687_s26 = smov (!%p289_p4, %s1153_s26), 31  ;;  %308 = sbr.rel (%p1157_p5) target bundleno = 238 (0xee), region = 52 }
   0xf   : > { %s296_s30 = scalar_lea.vmem %s1676_s2, %s1529_s27  ;;  %s1154_s8 = sshll.u32 %s1687_s26, 3  ;;  %vm422_vm0 = vcmask (!%p1157_p5), 7168   ;;  %v312_v0 = vld [vmem:[%s1678_s4] sm:$0xff] (!%p1157_p5)  ;;  %v1466_v1 = vmov (!%p1157_p5), 0.0   ;;  %vm313_vm1 = vcmask (!%p1157_p5), 64512   ;;  %v310_v3 = vld [vmem:[%s1674_s0 + $0x8] sm:$0xff] (!%p1157_p5) }
  0x10   : > { %s1156_s9 = sshll.u32 %s1687_s26, 2  ;;  %s1538_s12 = scalar_lea.vmem %s1675_s1, %s1154_s8  ;;  %1275 = vmatprep.subr.mxu0 (!%p1157_p5), %v1466_v1  ;;  %419 = vst [vmem:[#allocation3] sm:$0xff] (!%p1157_p5), %v1466_v1  ;;  %420 = vst [vmem:[#allocation3 + $0x8] sm:$0xff] (!%p1157_p5), %v1466_v1  ;;  %1364 = vmatprep.subr.mxu1 (!%p1157_p5), %v1466_v1  ;;  %v309_v2 = vld [vmem:[%s1674_s0] sm:$0xff] (!%p1157_p5)  ;;  %vm1467_vm2 = vmmov (!%p1157_p5), 0   ;;  %v311_v4 = vld [vmem:[%s1674_s0 + $0x10] sm:$0xff] (!%p1157_p5) }
  0x11   : > { %s1543_s15 = scalar_lea.vmem %s1677_s3, %s1156_s9  ;;  %421 = vst [vmem:[#allocation3 + $0x10] sm:$0xff] (!%p1157_p5), %v1466_v1  ;;  %423 = vst.msk [vmem:[#allocation4] sm:$0xff] (!%p1157_p5), %vm422_vm0, %v1466_v1  ;;  %1276 = vmatpush3.msra.mxu0 (!%p1157_p5), %v312_v0  ;;  %1365 = vmatpush3.msra.mxu1 (!%p1157_p5), %v312_v0 }
  0x12   : > { %424 = vst.msk [vmem:[#allocation4 + $0x8] sm:$0xff] (!%p1157_p5), %vm422_vm0, %v1466_v1  ;;  %425 = vst.msk [vmem:[#allocation4 + $0x10] sm:$0xff] (!%p1157_p5), %vm422_vm0, %v1466_v1  ;;  %1277 = vmatprep.mubr.msk.f32.mxu0 (!%p1157_p5), %vm1467_vm2, %v1466_v1  ;;  %1280 = vmatprep.mubr.msk.f32.mxu1 (!%p1157_p5), %vm1467_vm2, %v1466_v1 }
  0x13   : > { %1278 = vmatmul.mubr.msk.f32.vlgmr.msra.gmra.mrb[0].mxu0 (!%p1157_p5), %vm313_vm1, %v309_v2  ;;  %1281 = vmatmul.mubr.msk.f32.vlgmr.msra.gmra.mrb[0].mxu1 (!%p1157_p5), %vm313_vm1, %v310_v3 }
  0x14   : > { %1283 = vmatprep.mubr.msk.f32.mxu1 (!%p1157_p5), %vm1467_vm2, %v1466_v1 }
  0x17   : > { %1284 = vmatmul.mubr.msk.f32.gmra.mrb[2].mxu1 %vm313_vm1, %v311_v4 }
  0xe6   : > { %v389_v5 = vpop.f32.mrb[0].mxu0  ;;  %v394_v6 = vpop.f32.mrb[0].mxu1 }
  0xe7   : > { %v1230_v7 = vpack.c.bf16 %v394_v6, %v389_v5  ;;  %v1282_v8 = vpop.f32.mrb[1].mxu1  ;;  %v1279_v9 = vpop.f32.mrb[1].mxu0 }
  0xe9   : > { %1231 = vst [vmem:[#allocation2] sm:$0xff] %v1230_v7  }
  0xea   : > { %v399_v10 = vpop.f32.mrb[2].mxu1 }
  0xeb   : > { %v1226_v11 = vpack.c.bf16 %v399_v10, %v399_v10  ;;  %v1285_v12 = vpop.f32.mrb[3].mxu1 }
  0xed   : > { %418 = vst [vmem:[#allocation2 + $0x8] sm:$0xf] %v1226_v11 }
  0xee PF: > { %v428_v13 = vld [vmem:[%s1538_s12 + $0x10] sm:$0xff]  ;;  %v426_v14 = vld [vmem:[%s1538_s12] sm:$0xff]  ;;  %v1468_v15 = vmov 0   ;;  %v429_v16 = vld [vmem:[%s1538_s12 + $0x18] sm:$0xff]  ;;  %vm653_vm3 = vcmask 1041408   ;;  %vm628_vm4 = vcmask 31744   ;;  %v443_v43 = vlaneseq }
  0xef   : > { %1409 = vset.pattern.permute.xlu1 %v1468_v15  ;;  %1408 = vset.pattern.permute.xlu0 %v1468_v15  ;;  %v427_v17 = vld [vmem:[%s1538_s12 + $0x8] sm:$0xff]  ;;  %v430_v19 = vld [vmem:[%s1538_s12 + $0x20] sm:$0xff]  ;;  %v1413_v25 = vld [vmem:[%s1543_s15 + $0x10] sm:$0xff]   ;;  %vm788_vm5 = vcmask 1043456   ;;  %vm763_vm10 = vcmask 195584   ;;  %v1469_v49 = vmov 0.0  }
  0xf0   : > { %452 = vperm.xlu1 %1409, %v428_v13   ;;  %446 = vperm.xlu0 %1408, %v426_v14   ;;  %v431_v18 = vld [vmem:[%s1538_s12 + $0x28] sm:$0xff]  ;;  %v587_v20 = vld [vmem:[%s1679_s5] sm:$0x3]  ;;  %v1411_v23 = vld [vmem:[#allocation2] sm:$0xff]   ;;  %v1594_v44 = vand.u32 127, %v443_v43  ;;  %p1218_p6 = scmp.ne.s32.totalorder %s1522_s25, 1 }
  0xf1   : > { %v655_v21 = vsel %vm653_vm3, %v587_v20, 0  ;;  %v1410_v22 = vld [vmem:[%s1543_s15] sm:$0xff]   ;;  %1382 = vmatprep.subr.msk.bf16.mxu0 %vm653_vm3, %v587_v20  ;;  %v1412_v24 = vld [vmem:[%s1543_s15 + $0x8] sm:$0xff]   ;;  %v433_v26 = vld [vmem:[%s1538_s12 + $0x38] sm:$0xff] }
  0xf2   : > { %1287 = vmatpush3.bf16.msra.mxu0 %v655_v21  ;;  %1288 = vmatprep.mubr.msk.bf16.mxu0 %vm628_vm4, %v1410_v22  ;;  %v432_v27 = vld [vmem:[%s1538_s12 + $0x30] sm:$0xff]  ;;  %v435_v30 = vld [vmem:[%s1538_s12 + $0x48] sm:$0xff]  ;;  %v434_v31 = vld [vmem:[%s1538_s12 + $0x40] sm:$0xff]  ;;  %v550_v22 = vshrl.u32 %v443_v43, 7 }
  0xf3   : > { %1304 = vmatprep.subr.bf16.mxu0 %v1411_v23  ;;  %v1414_v32 = vld [vmem:[%s1543_s15 + $0x18] sm:$0xff]   ;;  %v1415_v33 = vld [vmem:[%s1543_s15 + $0x20] sm:$0xff]   ;;  %v436_v35 = vld [vmem:[%s1538_s12 + $0x50] sm:$0xff] }
  0xf4   : > { %455 = vperm.xlu1 %1409, %v429_v16   ;;  %449 = vperm.xlu0 %1408, %v427_v17   ;;  %v1416_v28 = vld [vmem:[#allocation2 + $0x8] ss:$0 sps:$4 sm:$0xff]   ;;  %v437_v34 = vld [vmem:[%s1538_s12 + $0x58] sm:$0xff]  ;;  %v439_v36 = vld [vmem:[%s1538_s12 + $0x68] sm:$0xff] }
  0xf5   : > { %1289 = vmatmul.mubr.msk.bf16.vlgmr.msra.gmra.mrb[0].mxu0 %vm628_vm4, %v1412_v24  ;;  %v790_v29 = vsel %vm788_vm5, %v1416_v28, 0  ;;  %v438_v37 = vld [vmem:[%s1538_s12 + $0x60] sm:$0xff]  ;;  %v1417_v38 = vld [vmem:[%s1543_s15 + $0x28] sm:$0xff]   ;;  %v1418_v39 = vld [vmem:[%s1543_s15 + $0x30] sm:$0xff]  }
  0xf6   : > { %1305 = vmatpush3.bf16.msra.mxu0 %v1411_v23  ;;  %1292 = vmatprep.mubr.msk.bf16.mxu0 %vm628_vm4, %v1413_v25  ;;  %v441_v40 = vld [vmem:[%s1538_s12 + $0x78] sm:$0xff]  ;;  %v440_v41 = vld [vmem:[%s1538_s12 + $0x70] sm:$0xff]  ;;  %v551_v23 = vadd.s32 8, %v550_v22  ;;  %v1180_v24 = vld [vmem:[%s296_s30] ss:$0 sm:$0xff]  ;;  %v552_v25 = vadd.s32 16, %v550_v22 }
  0xf7   : > { %1383 = vmatprep.subr.msk.bf16.mxu0 %vm788_vm5, %v1416_v28  ;;  %v1419_v42 = vld [vmem:[%s1543_s15 + $0x38] sm:$0xff]  }
  0xf8   : > { %461 = vperm.xlu1 %1409, %v431_v18   ;;  %458 = vperm.xlu0 %1408, %v430_v19  }
  0xfa   : > { %1307 = vmatpush3.bf16.msra.mxu0 %v790_v29 }
  0xfc   : > { %467 = vperm.xlu1 %1409, %v433_v26   ;;  %464 = vperm.xlu0 %1408, %v432_v27   ;;  %v1470_v27 = vmov 1.0|1.0  }
  0xfd   : > { %1293 = vmatmul.mubr.msk.bf16.gmra.mrb[4].mxu0 %vm628_vm4, %v1414_v32 }
  0xfe   : > { %1296 = vmatprep.mubr.msk.bf16.mxu0 %vm628_vm4, %v1415_v33 }
 0x100   : > { %473 = vperm.xlu1 %1409, %v435_v30   ;;  %470 = vperm.xlu0 %1408, %v434_v31  }
 0x104   : > { %479 = vperm.xlu1 %1409, %v437_v34   ;;  %476 = vperm.xlu0 %1408, %v436_v35  }
 0x105   : > { %1297 = vmatmul.mubr.msk.bf16.gmra.mrb[8].mxu0 %vm628_vm4, %v1417_v38 }
 0x106   : > { %1300 = vmatprep.mubr.msk.bf16.mxu0 %vm628_vm4, %v1418_v39 }
 0x108   : > { %485 = vperm.xlu1 %1409, %v439_v36   ;;  %482 = vperm.xlu0 %1408, %v438_v37  }
 0x10c   : > { %491 = vperm.xlu1 %1409, %v441_v40   ;;  %488 = vperm.xlu0 %1408, %v440_v41  }
 0x10d   : > { %1301 = vmatmul.mubr.msk.bf16.gmra.mrb[12].mxu0 %vm628_vm4, %v1419_v42 }
 0x16f   : > { %v453_v45 = vpop.permute.xlu1 %452  ;;  %v447_v46 = vpop.permute.xlu0 %446 }
 0x170   : > { %vm495_vm6 = vcmp.eq.s32.totalorder %v1594_v44, %v453_v45  ;;  %vm493_vm7 = vcmp.eq.s32.totalorder %v1594_v44, %v447_v46 }
 0x171   : > { %v1166_v50 = vsel %vm495_vm6, 1.0, %v1469_v49  ;;  %v1164_v51 = vsel %vm493_vm7, 1.0, %v1469_v49  ;;  %vm557_vm7 = vcmp.eq.s32.totalorder %v550_v22, %v1180_v24 }
 0x173   : > { %v456_v47 = vpop.permute.xlu1 %455  ;;  %v450_v48 = vpop.permute.xlu0 %449 }
 0x174   : > { %vm496_vm8 = vcmp.eq.s32.totalorder %v1594_v44, %v456_v47  ;;  %vm494_vm9 = vcmp.eq.s32.totalorder %v1594_v44, %v450_v48 }
 0x175   : > { %v1167_v52 = vsel %vm496_vm8, 1.0, %v1469_v49  ;;  %v1165_v53 = vsel %vm494_vm9, 1.0, %v1469_v49  ;;  %vm558_vm8 = vcmp.eq.s32.totalorder %v551_v23, %v1180_v24 }
 0x176   : > { %v542_v54 = vpack.c.bf16 %v1167_v52, %v1166_v50  ;;  %v541_v55 = vpack.c.bf16 %v1165_v53, %v1164_v51  ;;  %vm1626_vm9 = vmpackc.low %vm558_vm8, %vm557_vm7  ;;  %v1471_v53 = vmov 1065369472  }
 0x177   : > { %v462_v56 = vpop.permute.xlu1 %461  ;;  %v459_v57 = vpop.permute.xlu0 %458  ;;  %1340 = vmatprep.mubr.msk.bf16.mxu1 %vm1626_vm9, %v1470_v27 }
 0x178   : > { %vm498_vm11 = vcmp.eq.s32.totalorder %v1594_v44, %v462_v56  ;;  %vm497_vm12 = vcmp.eq.s32.totalorder %v1594_v44, %v459_v57  ;;  %1308 = vmatprep.mubr.msk.bf16.mxu0 %vm763_vm10, %v541_v55  ;;  %v897_v55 = vld [vmem:[#allocation3] sm:$0xff] }
 0x179   : > { %v1169_v58 = vsel %vm498_vm11, 1.0, %v1469_v49  ;;  %v1168_v59 = vsel %vm497_vm12, 1.0, %v1469_v49  ;;  %1309 = vmatmul.mubr.msk.bf16.vlgmr.msra.gmra.mrb[0].mxu0 %vm763_vm10, %v542_v54  ;;  %vm559_vm11 = vcmp.eq.s32.totalorder %v552_v25, %v1180_v24  ;;  %v899_v54 = vld [vmem:[#allocation3 + $0x10] sm:$0xff]  ;;  %vm1008_vm12 = vcmask 7168   ;;  %v1219_v24 = vld [vmem:[%s1680_s6] ss:$0 sm:$0xff] (!%p1218_p6) }
 0x17a   : > { %v543_v60 = vpack.c.bf16 %v1169_v58, %v1168_v59  ;;  %v898_v59 = vld [vmem:[#allocation3 + $0x8] sm:$0xff] }
 0x17b   : > { %v468_v61 = vpop.permute.xlu1 %467  ;;  %v465_v62 = vpop.permute.xlu0 %464 }
 0x17c   : > { %vm500_vm13 = vcmp.eq.s32.totalorder %v1594_v44, %v468_v61  ;;  %vm499_vm14 = vcmp.eq.s32.totalorder %v1594_v44, %v465_v62  ;;  %1312 = vmatprep.mubr.msk.bf16.mxu0 %vm763_vm10, %v543_v60 }
 0x17d   : > { %v1171_v63 = vsel %vm500_vm13, 1.0, %v1469_v49  ;;  %v1170_v0 = vsel %vm499_vm14, 1.0, %v1469_v49 }
 0x17e   : > { %v544_v1 = vpack.c.bf16 %v1171_v63, %v1170_v0  ;;  %v956_v0 = vld [vmem:[#allocation4 + $0x10] sm:$0xff] }
 0x17f   : > { %v474_v2 = vpop.permute.xlu1 %473  ;;  %v471_v3 = vpop.permute.xlu0 %470 }
 0x180   : > { %vm502_vm15 = vcmp.eq.s32.totalorder %v1594_v44, %v474_v2  ;;  %vm501_vm0 = vcmp.eq.s32.totalorder %v1594_v44, %v471_v3 }
 0x181   : > { %v1173_v4 = vsel %vm502_vm15, 1.0, %v1469_v49  ;;  %v1172_v5 = vsel %vm501_vm0, 1.0, %v1469_v49  ;;  %1313 = vmatmul.mubr.msk.bf16.gmra.mrb[4].mxu0 %vm763_vm10, %v544_v1  ;;  %v954_v1 = vld [vmem:[#allocation4] sm:$0xff] }
 0x182   : > { %v545_v6 = vpack.c.bf16 %v1173_v4, %v1172_v5  ;;  %v955_v5 = vld [vmem:[#allocation4 + $0x8] sm:$0xff] }
 0x183   : > { %v480_v7 = vpop.permute.xlu1 %479  ;;  %v477_v8 = vpop.permute.xlu0 %476 }
 0x184   : > { %vm504_vm1 = vcmp.eq.s32.totalorder %v1594_v44, %v480_v7  ;;  %vm503_vm2 = vcmp.eq.s32.totalorder %v1594_v44, %v477_v8  ;;  %1316 = vmatprep.mubr.msk.bf16.mxu0 %vm763_vm10, %v545_v6 }
 0x185   : > { %v1175_v9 = vsel %vm504_vm1, 1.0, %v1469_v49  ;;  %v1174_v10 = vsel %vm503_vm2, 1.0, %v1469_v49 }
 0x186   : > { %v546_v11 = vpack.c.bf16 %v1175_v9, %v1174_v10 }
 0x187   : > { %v486_v12 = vpop.permute.xlu1 %485  ;;  %v483_v13 = vpop.permute.xlu0 %482 }
 0x188   : > { %vm506_vm3 = vcmp.eq.s32.totalorder %v1594_v44, %v486_v12  ;;  %vm505_vm4 = vcmp.eq.s32.totalorder %v1594_v44, %v483_v13  ;;  %v1472_v13 = vmov (!%p1218_p6), 0  }
 0x189   : > { %v1177_v14 = vsel %vm506_vm3, 1.0, %v1469_v49  ;;  %v1176_v15 = vsel %vm505_vm4, 1.0, %v1469_v49  ;;  %1317 = vmatmul.mubr.msk.bf16.gmra.mrb[8].mxu0 %vm763_vm10, %v546_v11  ;;  %1420 = vset.pattern.permute.xlu1 (!%p1218_p6), %v1472_v13 }
 0x18a   : > { %v547_v16 = vpack.c.bf16 %v1177_v14, %v1176_v15  ;;  %1421 = vset.pattern.permute.xlu0 (!%p1218_p6), %v1472_v13 }
 0x18b   : > { %v492_v17 = vpop.permute.xlu1 %491  ;;  %v489_v18 = vpop.permute.xlu0 %488 }
 0x18c   : > { %vm508_vm5 = vcmp.eq.s32.totalorder %v1594_v44, %v492_v17  ;;  %vm507_vm6 = vcmp.eq.s32.totalorder %v1594_v44, %v489_v18  ;;  %1320 = vmatprep.mubr.msk.bf16.mxu0 %vm763_vm10, %v547_v16 }
 0x18d   : > { %v1179_v19 = vsel %vm508_vm5, 1.0, %v1469_v49  ;;  %v1178_v20 = vsel %vm507_vm6, 1.0, %v1469_v49 }
 0x18e   : > { %v548_v21 = vpack.c.bf16 %v1179_v19, %v1178_v20 }
 0x191   : > { %1321 = vmatmul.mubr.msk.bf16.gmra.mrb[12].mxu0 %vm763_vm10, %v548_v21  ;;  %vm1634_vm10 = vmpackc.low %vm559_vm11, %vm559_vm11 }
 0x24c   : > { %v1310_v28 = vpop.f32.mrb[0].mxu0 }
 0x24d   : > { %v826_v29 = vpop.f32.mrb[1].mxu0 }
 0x24e   : > { %v1311_v30 = vpop.f32.mrb[2].mxu0 }
 0x24f   : > { %v890_v31 = vpack.c.bf16 %v1311_v30, %v1310_v28  ;;  %v829_v32 = vpop.f32.mrb[3].mxu0 }
 0x250   : > { %v889_v33 = vpack.c.bf16 %v829_v32, %v826_v29 }
 0x252   : > { %1324 = vmatprep.subr.bf16.mxu1 %v889_v33 }
 0x253   : > { %1325 = vmatpush3.bf16.msra.mxu1 %v889_v33 }
 0x254   : > { %v1314_v34 = vpop.f32.mrb[4].mxu0  ;;  %1326 = vmatprep.subr.bf16.mxu1 %v890_v31 }
 0x255   : > { %v842_v35 = vpop.f32.mrb[5].mxu0 }
 0x256   : > { %v1315_v36 = vpop.f32.mrb[6].mxu0 }
 0x257   : > { %v892_v37 = vpack.c.bf16 %v1315_v36, %v1314_v34  ;;  %v845_v38 = vpop.f32.mrb[7].mxu0  ;;  %1327 = vmatpush3.bf16.msra.mxu1 %v890_v31 }
 0x258   : > { %v891_v39 = vpack.c.bf16 %v845_v38, %v842_v35 }
 0x25a   : > { %1328 = vmatprep.subr.bf16.mxu1 %v891_v39 }
 0x25b   : > { %1329 = vmatpush3.bf16.msra.mxu1 %v891_v39 }
 0x25c   : > { %v1318_v40 = vpop.f32.mrb[8].mxu0  ;;  %1330 = vmatprep.subr.bf16.mxu1 %v892_v37 }
 0x25d   : > { %v858_v41 = vpop.f32.mrb[9].mxu0 }
 0x25e   : > { %v1319_v42 = vpop.f32.mrb[10].mxu0 }
 0x25f   : > { %v894_v43 = vpack.c.bf16 %v1319_v42, %v1318_v40  ;;  %v861_v44 = vpop.f32.mrb[11].mxu0  ;;  %1331 = vmatpush3.bf16.msra.mxu1 %v892_v37 }
 0x260   : > { %v893_v45 = vpack.c.bf16 %v861_v44, %v858_v41 }
 0x262   : > { %1332 = vmatprep.subr.bf16.mxu1 %v893_v45 }
 0x263   : > { %1333 = vmatpush3.bf16.msra.mxu1 %v893_v45 }
 0x264   : > { %v1322_v46 = vpop.f32.mrb[12].mxu0  ;;  %1334 = vmatprep.subr.bf16.mxu1 %v894_v43 }
 0x265   : > { %v874_v47 = vpop.f32.mrb[13].mxu0 }
 0x266   : > { %v1323_v48 = vpop.f32.mrb[14].mxu0 }
 0x267   : > { %v896_v49 = vpack.c.bf16 %v1323_v48, %v1322_v46  ;;  %v877_v50 = vpop.f32.mrb[15].mxu0  ;;  %1335 = vmatpush3.bf16.msra.mxu1 %v894_v43 }
 0x268   : > { %v895_v51 = vpack.c.bf16 %v877_v50, %v874_v47 }
 0x26a   : > { %1336 = vmatprep.subr.bf16.mxu1 %v895_v51 }
 0x26b   : > { %1337 = vmatpush3.bf16.msra.mxu1 %v895_v51 }
 0x26c   : > { %1338 = vmatprep.subr.bf16.mxu1 %v896_v49 }
 0x26f   : > { %1339 = vmatpush3.bf16.msra.mxu1 %v896_v49 }
 0x270   : > { %1344 = vmatprep.subr.bf16.mxu1 %v1471_v53 }
 0x272   : > { %1341 = vmatmul.mubr.msk.bf16.vlgmr.msra.gmra.mrb[0].mxu1 %vm1634_vm10, %v1470_v27 }
 0x273   : > { %1345 = vmatpush3.bf16.msra.mxu1 %v1471_v53  ;;  %1360 = vmatprep.mubr.msk.bf16.mxu1 %vm1626_vm9, %v1470_v27 }
 0x274   : > { %1346 = vmatprep.subr.bf16.mxu1 %v1471_v53 }
 0x277   : > { %1347 = vmatpush3.bf16.msra.mxu1 %v1471_v53 }
 0x278   : > { %1348 = vmatprep.subr.bf16.mxu1 %v1471_v53 }
 0x27b   : > { %1349 = vmatpush3.bf16.msra.mxu1 %v1471_v53 }
 0x27c   : > { %1350 = vmatprep.subr.bf16.mxu1 %v1471_v53 }
 0x27f   : > { %1351 = vmatpush3.bf16.msra.mxu1 %v1471_v53 }
 0x280   : > { %1352 = vmatprep.subr.bf16.mxu1 %v1471_v53 }
 0x283   : > { %1353 = vmatpush3.bf16.msra.mxu1 %v1471_v53 }
 0x284   : > { %1354 = vmatprep.subr.bf16.mxu1 %v1471_v53 }
 0x287   : > { %1355 = vmatpush3.bf16.msra.mxu1 %v1471_v53 }
 0x288   : > { %1356 = vmatprep.subr.bf16.mxu1 %v1471_v53 }
 0x28b   : > { %1357 = vmatpush3.bf16.msra.mxu1 %v1471_v53 }
 0x28c   : > { %1358 = vmatprep.subr.bf16.mxu1 %v1471_v53 }
 0x28f   : > { %1359 = vmatpush3.bf16.msra.mxu1 %v1471_v53 }
 0x292   : > { %1361 = vmatmul.mubr.msk.bf16.vlgmr.msra.gmra.mrb[4].mxu1 %vm1634_vm10, %v1470_v27 }
 0x345   : > { %v1342_v56 = vpop.f32.mrb[0].mxu1 }
 0x346   : > { %v950_v57 = vadd.f32 %v1342_v56, %v899_v54  ;;  %v934_v58 = vpop.f32.mrb[1].mxu1 }
 0x347   : > { %v948_v60 = vadd.f32 %v934_v58, %v897_v55  ;;  %v1343_v61 = vpop.f32.mrb[2].mxu1 }
 0x348   : > { %953 = vst [vmem:[#allocation3 + $0x10] sm:$0xff] %v950_v57  ;;  %v937_v62 = vpop.f32.mrb[3].mxu1 }
 0x349   : > { %951 = vst [vmem:[#allocation3] sm:$0xff] %v948_v60  ;;  %v949_v63 = vadd.f32 %v937_v62, %v898_v59 }
 0x34b   : > { %952 = vst [vmem:[#allocation3 + $0x8] sm:$0xff] %v949_v63 }
 0x34f   : > { %v1027_v30 = vld [vmem:[#allocation3 + $0x10] sm:$0xff] (!%p1218_p6) }
 0x350   : > { %v1025_v25 = vld [vmem:[#allocation3] sm:$0xff] (!%p1218_p6) }
 0x352   : > { %v1026_v35 = vld [vmem:[#allocation3 + $0x8] sm:$0xff] (!%p1218_p6) }
 0x365   : > { %v1362_v2 = vpop.f32.mrb[4].mxu1  ;;  %1015 = sbr.rel (%p1218_p6) target bundleno = 1035 (0x40b), region = 56 }
 0x366   : > { %v1007_v3 = vadd.f32 %v1362_v2, %v956_v0  ;;  %v991_v4 = vpop.f32.mrb[5].mxu1 }
 0x367   : > { %v1005_v6 = vadd.f32 %v991_v4, %v954_v1  ;;  %v1363_v7 = vpop.f32.mrb[6].mxu1 }
 0x368   : > { %1011 = vst.msk [vmem:[#allocation4 + $0x10] sm:$0xff] %vm1008_vm12, %v1007_v3  ;;  %v994_v8 = vpop.f32.mrb[7].mxu1 }
 0x369   : > { %1009 = vst.msk [vmem:[#allocation4] sm:$0xff] %vm1008_vm12, %v1005_v6  ;;  %v1006_v9 = vadd.f32 %v994_v8, %v955_v5 }
 0x36b   : > { %1010 = vst.msk [vmem:[#allocation4 + $0x8] sm:$0xff] %vm1008_vm12, %v1006_v9 }
 0x36f   : > { %v1018_v11 = vld [vmem:[#allocation4 + $0x10] sm:$0xff] }
 0x370   : > { %v1016_v10 = vld [vmem:[#allocation4] sm:$0xff]  ;;  %v1021_v15 = vmax.f32 %v1018_v11, 1.0  ;;  %vm1048_vm14 = vcmp.gt.f32.partialorder %v1018_v11, 0.0 }
 0x371   : > { %vm1046_vm13 = vcmp.gt.f32.partialorder %v1016_v10, 0.0  ;;  %v1019_v14 = vmax.f32 %v1016_v10, 1.0  ;;  %v1052_v21 = vsel %vm1048_vm14, 1, %v1472_v13 }
 0x372   : > { %v1017_v12 = vld [vmem:[#allocation4 + $0x8] sm:$0xff]  ;;  %v1050_v16 = vsel %vm1046_vm13, 1, %v1472_v13 }
 0x373   : > { %v1020_v17 = vmax.f32 %v1017_v12, 1.0  ;;  %1054 = vperm.xlu1 %1420, %v1050_v16   ;;  %1422 = vrcp.f32 %v1019_v14  ;;  %vm1047_vm15 = vcmp.gt.f32.partialorder %v1017_v12, 0.0 }
 0x374   : > { %1424 = vrcp.f32 %v1021_v15  ;;  %v1051_v22 = vsel %vm1047_vm15, 1, %v1472_v13 }
 0x375   : > { %1426 = vrcp.f32 %v1020_v17 }
 0x37d   : > { %v1423_v18 = vpop.eup %1422 }
 0x37e   : > { %v1425_v19 = vpop.eup %1424  ;;  %1030 = vperm.xlu0 %1421, %v1423_v18  }
 0x37f   : > { %v1427_v20 = vpop.eup %1426  ;;  %1040 = vperm.xlu1 %1420, %v1425_v19  }
 0x382   : > { %1035 = vperm.xlu0 %1421, %v1427_v20  }
 0x383   : > { %1060 = vperm.xlu1 %1420, %v1052_v21  }
 0x386   : > { %1057 = vperm.xlu0 %1421, %v1051_v22  }
 0x3f2   : > { %v1055_v23 = vpop.permute.xlu1 %1054 }
 0x3f3   : > { %vm1062_vm0 = vcmp.eq.s32.totalorder %v1055_v23, 1 }
 0x3f4   : > { %v1071_v26 = vsel %vm1062_vm0, %v1219_v24, 0.0 }
 0x3fd   : > { %v1031_v27 = vpop.permute.xlu0 %1030 }
 0x3fe   : > { %v1041_v28 = vpop.permute.xlu1 %1040  ;;  %v1043_v29 = vmul.f32 %v1031_v27, %v1025_v25 }
 0x3ff   : > { %v1045_v34 = vmul.f32 %v1041_v28, %v1027_v30 }
 0x400   : > { %v1074_v31 = vadd.f32 %v1071_v26, %v1043_v29 }
 0x401   : > { %v1036_v32 = vpop.permute.xlu0 %1035 }
 0x402   : > { %1077 = vst [vmem:[#allocation5] sm:$0xff] %v1074_v31  ;;  %v1061_v33 = vpop.permute.xlu1 %1060  ;;  %v1044_v39 = vmul.f32 %v1036_v32, %v1026_v35 }
 0x403   : > { %vm1064_vm1 = vcmp.eq.s32.totalorder %v1061_v33, 1 }
 0x404   : > { %v1073_v36 = vsel %vm1064_vm1, %v1219_v24, 0.0 }
 0x405   : > { %v1076_v37 = vadd.f32 %v1073_v36, %v1045_v34  ;;  %v1058_v38 = vpop.permute.xlu0 %1057 }
 0x406   : > { %vm1063_vm2 = vcmp.eq.s32.totalorder %v1058_v38, 1 }
 0x407   : > { %1079 = vst [vmem:[#allocation5 + $0x10] sm:$0xff] %v1076_v37  ;;  %v1072_v40 = vsel %vm1063_vm2, %v1219_v24, 0.0 }
 0x408   : > { %v1075_v41 = vadd.f32 %v1072_v40, %v1044_v39 }
 0x40a   : > { %1078 = vst [vmem:[#allocation5 + $0x8] sm:$0xff] %v1075_v41 }
 0x40b PF: > { %p1388_p7 = scmp.eq.s32.totalorder %s1522_s25, 1  ;;  %s1473_s9 = smov [#allocation5]  }
 0x40c   : > { %s1086_s10 = sshll.u32 %s1473_s9, 4  ;;  %s1087_s10 = int_to_ptr.vmem [resolvable:$true] %s1086_s10 }
 0x40d   : > { %s1428_s11 = scalar_lea.vmem %s1087_s10, 384  ;;  %p1435_p11 = scmp.lt.s32.totalorder %s1087_s10, %s1087_s10 }
 0x40e   : > { %p1429_p8 = scmp.ne.s32.totalorder %s1087_s10, %s1428_s11  ;;  %p1436_p12 = scmp.lt.s32.totalorder %s1428_s11, %s1428_s11 }
 0x410   : > { %p1430_p9 = pnand %p1429_p8, %p1388_p7  ;;  %p1437_p13 = por %p1436_p12, %p1435_p11 }
 0x412   : > { %p1431_p10 = pneg %p1430_p9 }
 0x414   : > { %p1438_p0 = pnand %p1437_p13, %p1431_p10 }
 0x416   : > { %1441 = shalt.err (!%p1438_p0)
}
 0x417   : > { %s1442_s14 = scalar_lea.hbm %s1681_s7, 384 }
 0x418   : > { %p1443_p1 = scmp.ne.s32.totalorder %s1681_s7, %s1442_s14  ;;  %p1448_p4 = scmp.lt.u32.totalorder %s1442_s14, %s1681_s7 }
 0x41a   : > { %p1444_p2 = pnand %p1443_p1, %p1388_p7 }
 0x41c   : > { %p1445_p3 = pneg %p1444_p2 }
 0x41e   : > { %p1450_p5 = pnand %p1448_p4, %p1445_p3 }
 0x420   : > { %1453 = shalt.err (!%p1450_p5)
}
 0x421   : > { %s1474_s19 = smov 128   ;;  %s1475_s20 = smov 8  }
 0x422   : > { %1385 = dma.vmem_to_hbm [thread:$0]  (%p1388_p7), %s1087_s10, 384, %s1681_s7, [#allocation6], %s1474_s19, %s1474_s19, %s1475_s20  }
 0x423   : > { %1459 = dma.done.wait (%p1388_p7), [#allocation6], 384  }
 0x424   : > { %1461 = vsyncadd (%p1388_p7), [#allocation6], 4294966912 }
 0x425 PF: > { %s18_s24 = sadd.s32 1, %s1464_s24  }
 0x426   : > { %p15_p6 = scmp.ge.s32.totalorder %s18_s24, 4  }
 0x428   :  { %17 = sbr.rel (!%p15_p6) target bundleno = 1 (0x1), region = 89 }
 0x42f   :  { %1102 = vsyncpa [#allocation6], 1 }
 0x430   :  { %1104 = vsyncpa [#allocation6 + $0x1], 1 }

</bundles_post_ra>
